<compile_context>
chip_gen: v6e
topology: v6e:2x2x1
jax: 0.10.0
libtpu: 0.0.40
codegen_flags: <defaults>
</compile_context>

<pallas_src>
import math

import jax
import jax.numpy as jnp
from jax.experimental import pallas as pl
from jax.experimental.pallas import tpu as pltpu


# ----------------------------------------------------------------------------
# Utilities
# ----------------------------------------------------------------------------

_ROLL_LIKE_JNP = True      # pltpu.roll sign convention, verified by a startup probe
_VMEM_LIMIT = None


def _ceil_to(x, m):
    return ((x + m - 1) // m) * m


def _vmem_limit_bytes():
    """Per-generation VMEM budget: half of physical VMEM, capped at 64 MiB."""
    global _VMEM_LIMIT
    if _VMEM_LIMIT is None:
        try:
            cap = int(pltpu.get_tpu_info().vmem_capacity_bytes)
        except Exception:
            cap = 64 * 1024 * 1024
        _VMEM_LIMIT = int(min(cap // 2, 64 * 1024 * 1024))
    return _VMEM_LIMIT


def _detect_roll_semantics():
    """Pin pltpu.roll's sign convention against jnp.roll with a tiny probe kernel."""
    global _ROLL_LIKE_JNP

    def k(x_ref, o_ref):
        o_ref[...] = pltpu.roll(x_ref[...], 1, 1)

    x = jnp.arange(8 * 128, dtype=jnp.float32).reshape(8, 128)
    try:
        y = pl.pallas_call(k, out_shape=jax.ShapeDtypeStruct((8, 128), jnp.float32))(x)
        _ROLL_LIKE_JNP = bool(jnp.allclose(y, jnp.roll(x, 1, axis=1)))
    except Exception:
        _ROLL_LIKE_JNP = True


# ----------------------------------------------------------------------------
# Pallas kernels
# ----------------------------------------------------------------------------

def _make_spatial_kernel(H, W, n_convs):
    """Fused chain of n_convs x (5x5 'same' conv + InstanceNorm2d(affine) + Mish),
    spatial-in-lanes layout (H*W multiple of 128).

    refs = (x, [w, gamma, beta] * n_convs, out, [col_scratch] * n_convs)
      x:    (1, Ci0, H*W) f32
      w_k:  (Co_k, 25*Ci_k) bf16   (tap-major, ci-minor K ordering)
      gamma/beta: (Co_k, 1) f32
      out:  (1, Co_last, H*W) f32
      col_scratch_k: (25*Ci_k, H*W) bf16 VMEM (im2col slab -> one big-K matmul)
    """
    HW = H * W

    def kernel(*refs):
        x_ref = refs[0]
        o_ref = refs[1 + 3 * n_convs]
        col_refs = refs[2 + 3 * n_convs:]

        # 25 boundary masks / roll shifts for 'same' zero padding, built once.
        lane = jax.lax.broadcasted_iota(jnp.int32, (1, HW), 1)
        row = lane // W
        col = lane % W
        taps = []
        for dy in range(5):
            for dx in range(5):
                oy, ox = dy - 2, dx - 2
                mask = ((row + oy >= 0) & (row + oy < H) &
                        (col + ox >= 0) & (col + ox < W))
                delta = oy * W + ox
                shift = (-delta) % HW if _ROLL_LIKE_JNP else delta % HW
                taps.append((shift, mask))

        x = x_ref[0]                                            # (Ci, H*W) f32
        for k in range(n_convs):
            w_ref = refs[1 + 3 * k]
            g_ref = refs[2 + 3 * k]
            b_ref = refs[3 + 3 * k]
            col_ref = col_refs[k]
            ci = x.shape[0]
            # im2col via lane rolls (XLU) + masks; tile-aligned bf16 stores.
            for t, (shift, mask) in enumerate(taps):
                shifted = pltpu.roll(x, shift, 1) if shift else x
                piece = jnp.where(mask, shifted, 0.0).astype(jnp.bfloat16)
                col_ref[t * ci:(t + 1) * ci, :] = piece
            # One K = 25*Ci matmul on the MXU, f32 accumulation.
            acc = jnp.dot(w_ref[...], col_ref[...],
                          preferred_element_type=jnp.float32)   # (Co, H*W)
            # InstanceNorm2d (biased variance, eps=1e-5) + affine, per channel row.
            mean = jnp.mean(acc, axis=1, keepdims=True)
            var = jnp.mean(jnp.square(acc - mean), axis=1, keepdims=True)
            y = (acc - mean) * jax.lax.rsqrt(var + 1e-5)
            y = y * g_ref[...] + b_ref[...]
            # Mish
            x = y * jnp.tanh(jax.nn.softplus(y))
        o_ref[0] = x

    return kernel


def _make_deep_kernel(H, W):
    """Fused (5x5 conv + InstanceNorm + Mish) x2, channels-last layout for the deep
    levels (tiny H*W, Ci >= 128 so K already fills the MXU and C is lane-dense).
    Halo padding is built in VMEM scratches with tile-aligned stores:
    the data sits at rows [2, 2+H) and sublane-aligned columns [8, 8+W)."""

    def conv_in_mish(buf_ref, w_ref, g_ref, b_ref):
        ci = buf_ref.shape[2]
        co = w_ref.shape[2]
        acc = jnp.zeros((H * W, co), jnp.float32)
        for dy in range(5):
            for dx in range(5):
                patch = buf_ref[dy:dy + H, 6 + dx:6 + dx + W, :].reshape(H * W, ci)
                acc = acc + jnp.dot(patch.astype(jnp.bfloat16), w_ref[dy * 5 + dx],
                                    preferred_element_type=jnp.float32)
        mean = jnp.mean(acc, axis=0, keepdims=True)
        var = jnp.mean(jnp.square(acc - mean), axis=0, keepdims=True)
        y = (acc - mean) * jax.lax.rsqrt(var + 1e-5)
        y = y * g_ref[...] + b_ref[...]
        return y * jnp.tanh(jax.nn.softplus(y))

    def kernel(x_ref, w1_ref, g1_ref, b1_ref, w2_ref, g2_ref, b2_ref,
               o_ref, xpad_ref, ypad_ref):
        xpad_ref[...] = jnp.zeros(xpad_ref.shape, xpad_ref.dtype)
        xpad_ref[2:2 + H, 8:8 + W, :] = x_ref[0]
        y1 = conv_in_mish(xpad_ref, w1_ref, g1_ref, b1_ref)       # (H*W, C1)
        c1 = y1.shape[1]
        ypad_ref[...] = jnp.zeros(ypad_ref.shape, ypad_ref.dtype)
        ypad_ref[2:2 + H, 8:8 + W, :] = y1.reshape(H, W, c1)
        y2 = conv_in_mish(ypad_ref, w2_ref, g2_ref, b2_ref)       # (H*W, C2)
        o_ref[0] = y2.reshape(H, W, y2.shape[1])

    return kernel


# ----------------------------------------------------------------------------
# pallas_call wrappers
# ----------------------------------------------------------------------------

def spatial_block(convs, x, H, W):
    """x: (N, Ci_pad, H*W) f32 -> (N, Co_pad, H*W) f32 through len(convs) fused convs."""
    N, c0, HW = x.shape
    cout = convs[-1]['w'].shape[0]
    n_convs = len(convs)
    kernel = _make_spatial_kernel(H, W, n_convs)

    in_specs = [pl.BlockSpec((1, c0, HW), lambda n: (n, 0, 0))]
    args = [x]
    scratch = []
    for cv in convs:
        cop, k25 = cv['w'].shape
        in_specs.append(pl.BlockSpec((cop, k25), lambda n: (0, 0)))
        in_specs.append(pl.BlockSpec((cop, 1), lambda n: (0, 0)))
        in_specs.append(pl.BlockSpec((cop, 1), lambda n: (0, 0)))
        args += [cv['w'], cv['g'], cv['b']]
        scratch.append(pltpu.VMEM((k25, HW), jnp.bfloat16))

    return pl.pallas_call(
        kernel,
        out_shape=jax.ShapeDtypeStruct((N, cout, HW), jnp.float32),
        grid=(N,),
        in_specs=in_specs,
        out_specs=pl.BlockSpec((1, cout, HW), lambda n: (n, 0, 0)),
        scratch_shapes=scratch,
        compiler_params=pltpu.CompilerParams(
            dimension_semantics=("parallel",),
            vmem_limit_bytes=_vmem_limit_bytes()),
    )(*args)


def deep_block(convs, x):
    """x: (N, H, W, C0) f32 NHWC -> (N, H, W, C2) f32 through the fused conv pair."""
    N, H, W, c0 = x.shape
    c1 = convs[0]['w'].shape[2]
    c2 = convs[1]['w'].shape[2]
    kernel = _make_deep_kernel(H, W)

    in_specs = [pl.BlockSpec((1, H, W, c0), lambda n: (n, 0, 0, 0))]
    args = [x]
    for cv in convs:
        _, ci, co = cv['w'].shape
        in_specs.append(pl.BlockSpec((25, ci, co), lambda n: (0, 0, 0)))
        in_specs.append(pl.BlockSpec((1, co), lambda n: (0, 0)))
        in_specs.append(pl.BlockSpec((1, co), lambda n: (0, 0)))
        args += [cv['w'], cv['g'], cv['b']]

    return pl.pallas_call(
        kernel,
        out_shape=jax.ShapeDtypeStruct((N, H, W, c2), jnp.float32),
        grid=(N,),
        in_specs=in_specs,
        out_specs=pl.BlockSpec((1, H, W, c2), lambda n: (n, 0, 0, 0)),
        scratch_shapes=[pltpu.VMEM((H + 4, W + 12, c0), jnp.float32),
                        pltpu.VMEM((H + 4, W + 12, c1), jnp.float32)],
        compiler_params=pltpu.CompilerParams(
            dimension_semantics=("parallel",),
            vmem_limit_bytes=_vmem_limit_bytes()),
    )(*args)


# ----------------------------------------------------------------------------
# One-time weight preparation (routing is constant because t == ones in eval)
# ----------------------------------------------------------------------------

def _route_kernel(p):
    """Routed 5x5 kernel for eval mode (sample-0 gate, t = 1): (Co, Ci, 5, 5)."""
    co = p['w5'].shape[0]
    g = p['gate_w'][:, 0] + p['gate_b']             # Linear(num_tasks=1) at t=1
    g = jax.nn.softmax(g.reshape(5, co), axis=0)    # softmax over experts
    pool3 = jnp.full((3, 3), 1.0 / 9.0, jnp.float32)
    pool5 = jnp.full((5, 5), 1.0 / 25.0, jnp.float32)

    def pad5(k):
        ph = (5 - k.shape[2]) // 2
        pw = (5 - k.shape[3]) // 2
        return jnp.pad(k, ((0, 0), (0, 0), (ph, ph), (pw, pw)))

    experts = [p['w5'], pad5(p['w3']), pad5(p['w1']),
               pad5(p['wa3'] * pool3), p['wa5'] * pool5]
    return sum(g[e][:, None, None, None] * experts[e] for e in range(5))


def _prep_spatial(p):
    wk = _route_kernel(p)
    co, ci = wk.shape[0], wk.shape[1]
    cop, cip = _ceil_to(co, 16), _ceil_to(ci, 16)
    wk = jnp.pad(wk, ((0, cop - co), (0, cip - ci), (0, 0), (0, 0)))
    w2d = jnp.transpose(wk, (0, 2, 3, 1)).reshape(cop, 25 * cip).astype(jnp.bfloat16)
    gamma = jnp.pad(p['gamma'], (0, cop - co), constant_values=1.0).reshape(cop, 1)
    beta = jnp.pad(p['beta'], (0, cop - co)).reshape(cop, 1)
    return {'w': w2d, 'g': gamma, 'b': beta}


def _prep_deep(p):
    wk = _route_kernel(p)
    co, ci = wk.shape[0], wk.shape[1]
    cop, cip = _ceil_to(co, 16), _ceil_to(ci, 16)
    wk = jnp.pad(wk, ((0, cop - co), (0, cip - ci), (0, 0), (0, 0)))
    w25 = jnp.transpose(wk, (2, 3, 1, 0)).reshape(25, cip, cop).astype(jnp.bfloat16)
    gamma = jnp.pad(p['gamma'], (0, cop - co), constant_values=1.0).reshape(1, cop)
    beta = jnp.pad(p['beta'], (0, cop - co)).reshape(1, cop)
    return {'w': w25, 'g': gamma, 'b': beta}


def prepare_params(params):
    return {
        're1': [_prep_spatial(params['re1']['conv1']), _prep_spatial(params['re1']['conv2'])],
        're2': [_prep_spatial(params['re2']['conv1']), _prep_spatial(params['re2']['conv2'])],
        're3': [_prep_spatial(params['re3']['conv1']), _prep_spatial(params['re3']['conv2'])],
        'rd2': [_prep_spatial(params['rd2']['conv1']), _prep_spatial(params['rd2']['conv2'])],
        'rd3': [_prep_spatial(params['rd3']['conv1']), _prep_spatial(params['rd3']['conv2'])],
        'rd4_out': [_prep_spatial(params['rd4']['conv1']),
                    _prep_spatial(params['rd4']['conv2']),
                    _prep_spatial(params['out'])],
        're4': [_prep_deep(params['re4']['conv1']), _prep_deep(params['re4']['conv2'])],
        'rb': [_prep_deep(params['rb']['conv1']), _prep_deep(params['rb']['conv2'])],
        'rd1': [_prep_deep(params['rd1']['conv1']), _prep_deep(params['rd1']['conv2'])],
        'dotmat': params['dotmat'][:, :, 0],
    }


# ----------------------------------------------------------------------------
# Layout glue (pixel (un)shuffle, concat, transposes) — plain XLA, tiny tensors
# ----------------------------------------------------------------------------

def pixel_unshuffle_flat(x, H, W):
    """(N, C, H*W) -> (N, 4C, (H/2)*(W/2)), torch NCHW PixelUnshuffle(2) ordering."""
    N, C, _ = x.shape
    x = x.reshape(N, C, H // 2, 2, W // 2, 2)
    x = jnp.transpose(x, (0, 1, 3, 5, 2, 4))
    return x.reshape(N, C * 4, (H // 2) * (W // 2))


def pixel_shuffle_flat(x, H, W):
    """(N, 4C, H*W) -> (N, C, (2H)*(2W)), torch NCHW PixelShuffle(2) ordering."""
    N, C4, _ = x.shape
    C = C4 // 4
    x = x.reshape(N, C, 2, 2, H, W)
    x = jnp.transpose(x, (0, 1, 4, 2, 5, 3))
    return x.reshape(N, C, (H * 2) * (W * 2))


def pixel_unshuffle_nhwc(x):
    N, H, W, C = x.shape
    x = x.reshape(N, H // 2, 2, W // 2, 2, C)
    x = jnp.transpose(x, (0, 1, 3, 5, 2, 4))
    return x.reshape(N, H // 2, W // 2, C * 4)


def pixel_shuffle_nhwc(x):
    N, H, W, C4 = x.shape
    C = C4 // 4
    x = x.reshape(N, H, W, C, 2, 2)
    x = jnp.transpose(x, (0, 1, 4, 2, 5, 3))
    return x.reshape(N, H * 2, W * 2, C)


def nchw_flat_to_nhwc(x, H, W):
    N, C, _ = x.shape
    return jnp.transpose(x.reshape(N, C, H, W), (0, 2, 3, 1))


def nhwc_to_nchw_flat(x):
    N, H, W, C = x.shape
    return jnp.transpose(x, (0, 3, 1, 2)).reshape(N, C, H * W)


def _pad_channels(x, c_target):
    c = x.shape[1]
    if c == c_target:
        return x
    return jnp.pad(x, ((0, 0), (0, c_target - c), (0, 0)))


# ----------------------------------------------------------------------------
# Deterministic parameter init (shapes match the PyTorch module)
# ----------------------------------------------------------------------------

def _kaiming_uniform_fanout(key, co, ci, k):
    a = math.sqrt(5.0)
    fan_out = co * k * k
    gain = math.sqrt(2.0 / (1.0 + a * a))
    bound = math.sqrt(3.0) * gain / math.sqrt(fan_out)
    return jax.random.uniform(key, (co, ci, k, k), jnp.float32, -bound, bound)


def init_modeconv(key, ci, co):
    ks = jax.random.split(key, 7)
    return {
        'w5': _kaiming_uniform_fanout(ks[0], co, ci, 5),
        'w3': _kaiming_uniform_fanout(ks[1], co, ci, 3),
        'w1': _kaiming_uniform_fanout(ks[2], co, ci, 1),
        'wa3': _kaiming_uniform_fanout(ks[3], co, ci, 1),
        'wa5': _kaiming_uniform_fanout(ks[4], co, ci, 1),
        'gate_w': jax.random.uniform(ks[5], (5 * co, 1), jnp.float32, -1.0, 1.0),
        'gate_b': jax.random.uniform(ks[6], (5 * co,), jnp.float32, -1.0, 1.0),
        'gamma': jnp.ones((co,), jnp.float32),
        'beta': jnp.zeros((co,), jnp.float32),
    }


def init_subnet(key, n_in, n_out):
    k1, k2 = jax.random.split(key)
    return {'conv1': init_modeconv(k1, n_in, n_out),
            'conv2': init_modeconv(k2, n_out, n_out)}


def init_params(key):
    numc = 16
    cfg = [
        ('re1', 1, numc),
        ('re2', numc * 4, numc * 2),
        ('re3', numc * 2 * 4, numc * 4),
        ('re4', numc * 4 * 4, numc * 8),
        ('rb', numc * 8 * 4, numc * 16),
        ('rd1', numc * 16 // 4 + numc * 8, numc * 8),
        ('rd2', numc * 8 // 4 + numc * 4, numc * 4),
        ('rd3', numc * 4 // 4 + numc * 2, numc * 2),
        ('rd4', numc * 2 // 4 + numc, numc),
    ]
    keys = jax.random.split(key, len(cfg) + 2)
    params = {}
    for (name, ci, co), k in zip(cfg, keys[:len(cfg)]):
        params[name] = init_subnet(k, ci, co)
    params['out'] = init_modeconv(keys[-2], numc, 2)
    params['dotmat'] = jax.random.normal(keys[-1], (2, 128, 1), jnp.float32) * 1.0
    return params


# ----------------------------------------------------------------------------
# plExtractor forward
# ----------------------------------------------------------------------------

def forward(prep, x):
    """x: (N, K, 1, H, W); returns (out, out) with out shape (N, 2, 1, H)."""
    x = x[:, 0]                                      # (N, 1, H, W)
    N, _, H, W = x.shape

    def cin_of(block):
        return block[0]['w'].shape[1] // 25

    # ------- encoder -------
    a = _pad_channels(x.reshape(N, 1, H * W), cin_of(prep['re1']))
    x1 = spatial_block(prep['re1'], a, H, W)                       # (N, 16, H*W)

    a = pixel_unshuffle_flat(x1, H, W)
    x2 = spatial_block(prep['re2'], a, H // 2, W // 2)             # (N, 32, ·)

    a = pixel_unshuffle_flat(x2, H // 2, W // 2)
    x3 = spatial_block(prep['re3'], a, H // 4, W // 4)             # (N, 64, ·)

    a = pixel_unshuffle_flat(x3, H // 4, W // 4)
    a = nchw_flat_to_nhwc(a, H // 8, W // 8)
    x4 = deep_block(prep['re4'], a)                                # (N, H/8, W/8, 128)

    a = pixel_unshuffle_nhwc(x4)
    lat = deep_block(prep['rb'], a)                                # (N, H/16, W/16, 256)
    lat = pixel_shuffle_nhwc(lat)                                  # (N, H/8, W/8, 64)

    # ------- decoder -------
    a = jnp.concatenate([lat, x4], axis=-1)                        # 192
    d4 = deep_block(prep['rd1'], a)                                # 128

    a = nhwc_to_nchw_flat(pixel_shuffle_nhwc(d4))                  # (N, 32, (H/4)*(W/4))
    a = jnp.concatenate([a, x3], axis=1)                           # 96
    d3 = spatial_block(prep['rd2'], a, H // 4, W // 4)             # 64

    a = pixel_shuffle_flat(d3, H // 4, W // 4)                     # (N, 16, (H/2)*(W/2))
    a = jnp.concatenate([a, x2], axis=1)                           # 48
    d2 = spatial_block(prep['rd3'], a, H // 2, W // 2)             # 32

    a = pixel_shuffle_flat(d2, H // 2, W // 2)                     # (N, 8, H*W)
    a = jnp.concatenate([a, x1], axis=1)                           # 24
    a = _pad_channels(a, cin_of(prep['rd4_out']))                  # 32
    y = spatial_block(prep['rd4_out'], a, H, W)                    # (N, 16, H*W); ch 0..1 real

    # Head (bmm + sigmoid): ~8K MACs, left to plain XLA per the review.
    y = y[:, :2, :].reshape(N, 2, H, W)
    s = jnp.einsum('nchw,cw->nch', y, prep['dotmat'])
    out = jax.nn.sigmoid(s)[:, :, None, :]                         # (N, 2, 1, H)
    return out, out


# ----------------------------------------------------------------------------

if __name__ == "__main__":
    _detect_roll_semantics()

    key = jax.random.PRNGKey(0)
    pkey, xkey = jax.random.split(key)
    params = init_params(pkey)
    prep = jax.jit(prepare_params)(params)      # one-time routing / layout / bf16 cast

    # W must be 128 (fixed by dotmat (2,128,1)); H divisible by 16 (4x pixel-unshuffle).
    N, H, W = 2, 16, 128
    x = jax.random.normal(xkey, (N, 1, 1, H, W), jnp.float32)

    fwd = jax.jit(forward)
    y, _ = fwd(prep, x)
    jax.block_until_ready(y)
    assert y.shape == (N, 2, 1, H), y.shape
    assert bool(jnp.all(jnp.isfinite(y)))
    print("KERNEL_OK")
</pallas_src>

<mosaic_0001>
module attributes {stable_mosaic.version = 11 : i64} {
  func.func @k(%arg0: memref<8x128xf32, #tpu.memory_space<vmem>>, %arg1: memref<8x128xf32, #tpu.memory_space<vmem>>) attributes {dimension_semantics = [], scalar_prefetch = 0 : i64, scratch_operands = 0 : i64, tpu.core_type = #tpu.core_type<tc>} {
    %c0 = arith.constant 0 : index
    %c0_0 = arith.constant 0 : index
    %0 = vector.load %arg0[%c0, %c0_0] : memref<8x128xf32, #tpu.memory_space<vmem>>, vector<8x128xf32>
    %c1_i32 = arith.constant 1 : i32
    %1 = tpu.dynamic_rotate %0 by %c1_i32 dim 1 : vector<8x128xf32>, i32 -> vector<8x128xf32>
    %c0_1 = arith.constant 0 : index
    %c0_2 = arith.constant 0 : index
    %2 = vector.load %arg1[%c0_1, %c0_2] : memref<8x128xf32, #tpu.memory_space<vmem>>, vector<8x128xf32>
    tpu.vector_store %arg1[%c0_1, %c0_2], %1 {strides = array<i32>} : memref<8x128xf32, #tpu.memory_space<vmem>>, vector<8x128xf32>,
    return
  }
}

</mosaic_0001>

<bundles_post_ra>
// kernel: tpu_custom_call.1
= control target key start
LH: loop header
LB: loop body
LE: loop exit
PB: predicated region body
PF: predicated region fallthrough
CT: control target
= control target key end

     0   :  { %6 = vsyncpa [#allocation3], 0  ;;  %s106_s0 = inlined_call_operand.hbm [shape: f32[8,128], index: 0, kind: input, shape index: {}]   ;;  %s107_s1 = inlined_call_operand.hbm [shape: f32[8,128], index: 1, kind: output, shape index: {}]  }
   0x1   :  { %7 = vsyncpa [#allocation4], 0  ;;  %s87_s6 = smov [#allocation2]  }
   0x2   :  { %s14_s7 = sshll.u32 %s87_s6, 4  ;;  %s15_s7 = int_to_ptr.vmem [resolvable:$true] %s14_s7 }
   0x3   :  { %s51_s8 = scalar_lea.vmem %s15_s7, 128  ;;  %p56_p1 = scmp.lt.s32.totalorder %s15_s7, %s15_s7 }
   0x4   :  { %p52_p0 = scmp.ne.s32.totalorder %s15_s7, %s51_s8  ;;  %p57_p2 = scmp.lt.s32.totalorder %s51_s8, %s51_s8 }
   0x6   :  { %p58_p3 = por %p57_p2, %p56_p1 }
   0x8   :  { %p59_p4 = pnand %p58_p3, %p52_p0 }
   0xa   :  { %62 = shalt.err (!%p59_p4)
}
   0xb   :  { %17 = dma.hbm_to_vmem [thread:$0]  %s106_s0, 128, %s15_s7, [#allocation3]  }
   0xc   :  { %83 = dma.done.wait [#allocation3], 128  }
   0xd   :  { %84 = vsyncadd [#allocation3], 4294967168  ;;  %v21_v0 = vld [vmem:[#allocation2] sm:$0xff]  ;;  %s88_s11 = smov 1   ;;  %s89_s12 = smov [#allocation5]  }
   0xe   :  { %22 = vrot.lane.b32.xlu0 %v21_v0, %s88_s11  ;;  %s31_s13 = sshll.u32 %s89_s12, 4  ;;  %s32_s13 = int_to_ptr.vmem [resolvable:$true] %s31_s13 }
   0xf   :  { %s63_s14 = scalar_lea.vmem %s32_s13, 128  ;;  %p68_p6 = scmp.lt.s32.totalorder %s32_s13, %s32_s13 }
  0x10   :  { %p64_p5 = scmp.ne.s32.totalorder %s32_s13, %s63_s14  ;;  %p69_p7 = scmp.lt.s32.totalorder %s63_s14, %s63_s14 }
  0x12   :  { %p70_p8 = por %p69_p7, %p68_p6 }
  0x14   :  { %p71_p9 = pnand %p70_p8, %p64_p5 }
  0x80   :  { %v23_v1 = vpop.permute.xlu0 %22 }
  0x81   :  { %24 = vst [vmem:[#allocation5] sm:$0xff] %v23_v1 }
  0x82   :  { %74 = shalt.err (!%p71_p9)
}
  0x83   :  { %34 = dma.vmem_to_hbm [thread:$0]  %s32_s13, 128, %s107_s1, [#allocation4]  }
  0x84   :  { %85 = dma.done.wait [#allocation4], 128  }
  0x85   :  { %86 = vsyncadd [#allocation4], 4294967168 }
  0x86   :  { %38 = vsyncpa [#allocation3], 1 }
  0x87   :  { %39 = vsyncpa [#allocation4], 1 }

</bundles_post_ra>
